<compile_context>
chip_gen: v6e
topology: v6e:2x2x1
jax: 0.10.0
libtpu: 0.0.40
codegen_flags: <defaults>
</compile_context>

<pallas_src>
import jax
import jax.numpy as jnp
from jax.experimental import pallas as pl
from jax.experimental.pallas import tpu as pltpu


def mlp_kernel(x_ref, w1_ref, b1_ref, w2_ref, b2_ref, w3_ref, b3_ref, o_ref):
    # x_ref: (n_in, TILE_B) -- batch on the lane (last) axis, fully lane-dense.
    x = x_ref[...]

    # hidden1 + sigmoid : (10, n_in) @ (n_in, TILE_B) -> (10, TILE_B)
    h1 = jnp.dot(w1_ref[...], x, preferred_element_type=jnp.float32) + b1_ref[...]
    h1 = jax.nn.sigmoid(h1)

    # hidden2 + sigmoid : (8, 10) @ (10, TILE_B) -> (8, TILE_B)
    h2 = jnp.dot(w2_ref[...], h1, preferred_element_type=jnp.float32) + b2_ref[...]
    h2 = jax.nn.sigmoid(h2)

    # hidden3 (no activation) : (1, 8) @ (8, TILE_B) -> (1, TILE_B)
    out = jnp.dot(w3_ref[...], h2, preferred_element_type=jnp.float32) + b3_ref[...]
    o_ref[...] = out.astype(o_ref.dtype)          # lane-dense, unmasked store


def _round_up(n, m):
    return (n + m - 1) // m * m


def mlp_forward(x, params, *, tile_b=8192):
    """x: (B, n_inputs) float32 (PyTorch layout). Returns (B, 1) float32."""
    w1, b1, w2, b2, w3, b3 = params            # w: (out, in), b: (out, 1)
    B, n_in = x.shape

    # Batch lives on the lane axis inside the kernel -> tile is a multiple of 128.
    tile_b = _round_up(max(1, tile_b), 128)
    # Never (much) larger than the batch itself ...
    tile_b = min(tile_b, _round_up(B, 128))
    # ... and give v7x's two TensorCores at least 2 grid steps to split.
    tile_b = max(128, min(tile_b, _round_up(pl.cdiv(B, 2), 128)))

    grid = (pl.cdiv(B, tile_b),)               # ragged last block handled by Pallas

    # One wrapper-side transpose makes every in-kernel tensor lane-dense.
    x_t = x.T                                  # (n_in, B)

    def const(arr):
        # Whole array as one block; constant index map -> resident across steps.
        return pl.BlockSpec(arr.shape, lambda i: (0,) * arr.ndim)

    # Always pass an explicit VMEM limit (v5e's scoped default is only 16 MiB).
    param_bytes = 4 * sum(int(p.size) for p in (w1, b1, w2, b2, w3, b3))
    vmem_limit = int(2 * (n_in + 1) * tile_b * 4   # double-buffered X / out tiles
                     + 2 * param_bytes             # resident params (padded, x2)
                     + (16 << 20))                 # headroom for intermediates

    out = pl.pallas_call(
        mlp_kernel,
        out_shape=jax.ShapeDtypeStruct((1, B), jnp.float32),
        grid=grid,
        in_specs=[
            pl.BlockSpec((n_in, tile_b), lambda i: (0, i)),
            const(w1), const(b1),
            const(w2), const(b2),
            const(w3), const(b3),
        ],
        out_specs=pl.BlockSpec((1, tile_b), lambda i: (0, i)),
        compiler_params=pltpu.CompilerParams(
            dimension_semantics=("parallel",),
            vmem_limit_bytes=vmem_limit,
        ),
    )(x_t, w1, b1, w2, b2, w3, b3)
    return out.reshape(B, 1)


def xavier_uniform(key, fan_out, fan_in):
    # matches torch.nn.init.xavier_uniform_ (gain=1); stored as (out, in)
    limit = jnp.sqrt(6.0 / (fan_in + fan_out))
    return jax.random.uniform(key, (fan_out, fan_in), jnp.float32, -limit, limit)


def init_params(key, n_inputs):
    k1, k2, k3, kb1, kb2, kb3 = jax.random.split(key, 6)
    w1 = xavier_uniform(k1, 10, n_inputs)
    w2 = xavier_uniform(k2, 8, 10)
    w3 = xavier_uniform(k3, 1, 8)
    # PyTorch Linear default bias init: U(-1/sqrt(fan_in), 1/sqrt(fan_in)),
    # stored as (out, 1) so the kernel can lane-broadcast it.
    b1 = jax.random.uniform(kb1, (10, 1), jnp.float32,
                            -1.0 / jnp.sqrt(1.0 * n_inputs), 1.0 / jnp.sqrt(1.0 * n_inputs))
    b2 = jax.random.uniform(kb2, (8, 1), jnp.float32,
                            -1.0 / jnp.sqrt(10.0), 1.0 / jnp.sqrt(10.0))
    b3 = jax.random.uniform(kb3, (1, 1), jnp.float32,
                            -1.0 / jnp.sqrt(8.0), 1.0 / jnp.sqrt(8.0))
    return w1, b1, w2, b2, w3, b3


def reference_forward(x, params):
    w1, b1, w2, b2, w3, b3 = params
    h1 = jax.nn.sigmoid(x @ w1.T + b1[:, 0])
    h2 = jax.nn.sigmoid(h1 @ w2.T + b2[:, 0])
    return h2 @ w3.T + b3[:, 0]


if __name__ == "__main__":
    key = jax.random.PRNGKey(0)
    kx, kx2, kp = jax.random.split(key, 3)

    n_inputs = 16
    params = init_params(kp, n_inputs)

    # Small shape consistent with the module.
    batch = 8
    x = jax.random.normal(kx, (batch, n_inputs), jnp.float32)
    out = jax.block_until_ready(mlp_forward(x, params))
    ref = reference_forward(x, params)
    assert out.shape == (batch, 1)
    assert jnp.allclose(out, ref, atol=1e-5, rtol=1e-5), \
        float(jnp.max(jnp.abs(out - ref)))

    # Exercise the multi-step grid + ragged last block path (no padding pass).
    batch2 = 300                      # not a multiple of the lane tile
    x2 = jax.random.normal(kx2, (batch2, n_inputs), jnp.float32)
    out2 = jax.block_until_ready(mlp_forward(x2, params))
    ref2 = reference_forward(x2, params)
    assert out2.shape == (batch2, 1)
    assert jnp.allclose(out2, ref2, atol=1e-5, rtol=1e-5), \
        float(jnp.max(jnp.abs(out2 - ref2)))

    print("KERNEL_OK")
</pallas_src>

<mosaic_0001>
module attributes {stable_mosaic.version = 11 : i64} {
  func.func @mlp_kernel(%arg0: i32, %arg1: memref<16x128xf32, #tpu.memory_space<vmem>>, %arg2: memref<10x16xf32, #tpu.memory_space<vmem>>, %arg3: memref<10x1xf32, #tpu.memory_space<vmem>>, %arg4: memref<8x10xf32, #tpu.memory_space<vmem>>, %arg5: memref<8x1xf32, #tpu.memory_space<vmem>>, %arg6: memref<1x8xf32, #tpu.memory_space<vmem>>, %arg7: memref<1x1xf32, #tpu.memory_space<vmem>>, %arg8: memref<1x128xf32, #tpu.memory_space<vmem>>) attributes {dimension_semantics = [#tpu.dimension_semantics<parallel>], iteration_bounds = array<i64: 1>, scalar_prefetch = 0 : i64, scratch_operands = 0 : i64, tpu.core_type = #tpu.core_type<tc>, window_params = [{transform_indices = @transform_0, window_bounds = array<i64: 16, 128>}, {pipeline_mode = #tpu.pipeline_mode<synchronous>, transform_indices = @transform_1, window_bounds = array<i64: 10, 16>}, {pipeline_mode = #tpu.pipeline_mode<synchronous>, transform_indices = @transform_2, window_bounds = array<i64: 10, 1>}, {pipeline_mode = #tpu.pipeline_mode<synchronous>, transform_indices = @transform_3, window_bounds = array<i64: 8, 10>}, {pipeline_mode = #tpu.pipeline_mode<synchronous>, transform_indices = @transform_4, window_bounds = array<i64: 8, 1>}, {pipeline_mode = #tpu.pipeline_mode<synchronous>, transform_indices = @transform_5, window_bounds = array<i64: 1, 8>}, {pipeline_mode = #tpu.pipeline_mode<synchronous>, transform_indices = @transform_6, window_bounds = array<i64: 1, 1>}, {transform_indices = @transform_7, window_bounds = array<i64: 1, 128>}]} {
    %c0 = arith.constant 0 : index
    %c0_0 = arith.constant 0 : index
    %0 = vector.load %arg1[%c0, %c0_0] : memref<16x128xf32, #tpu.memory_space<vmem>>, vector<16x128xf32>
    %c0_1 = arith.constant 0 : index
    %c0_2 = arith.constant 0 : index
    %1 = vector.load %arg2[%c0_1, %c0_2] : memref<10x16xf32, #tpu.memory_space<vmem>>, vector<10x16xf32>
    %cst = arith.constant dense<0.000000e+00> : vector<10x128xf32>
    %2 = tpu.matmul %1, %0, %cst {dimension_numbers = #tpu.dot_dimension_numbers<[1], [0], [0], [1], [0, 0, 1, 1], [], []>} : vector<10x16xf32>, vector<16x128xf32>, vector<10x128xf32> -> vector<10x128xf32>
    %c0_3 = arith.constant 0 : index
    %c0_4 = arith.constant 0 : index
    %3 = vector.load %arg3[%c0_3, %c0_4] : memref<10x1xf32, #tpu.memory_space<vmem>>, vector<10x1xf32>
    %4 = vector.broadcast %3 : vector<10x1xf32> to vector<10x128xf32>
    %5 = arith.addf %2, %4 : vector<10x128xf32>
    %6 = arith.negf %5 : vector<10x128xf32>
    %7 = math.exp %6 : vector<10x128xf32>
    %cst_5 = arith.constant 1.000000e+00 : f32
    %8 = vector.broadcast %cst_5 : f32 to vector<10x128xf32>
    %9 = arith.addf %8, %7 : vector<10x128xf32>
    %10 = arith.divf %8, %9 : vector<10x128xf32>
    %c0_6 = arith.constant 0 : index
    %c0_7 = arith.constant 0 : index
    %11 = vector.load %arg4[%c0_6, %c0_7] : memref<8x10xf32, #tpu.memory_space<vmem>>, vector<8x10xf32>
    %cst_8 = arith.constant dense<0.000000e+00> : vector<8x128xf32>
    %12 = tpu.matmul %11, %10, %cst_8 {dimension_numbers = #tpu.dot_dimension_numbers<[1], [0], [0], [1], [0, 0, 1, 1], [], []>} : vector<8x10xf32>, vector<10x128xf32>, vector<8x128xf32> -> vector<8x128xf32>
    %c0_9 = arith.constant 0 : index
    %c0_10 = arith.constant 0 : index
    %13 = vector.load %arg5[%c0_9, %c0_10] : memref<8x1xf32, #tpu.memory_space<vmem>>, vector<8x1xf32>
    %14 = vector.broadcast %13 : vector<8x1xf32> to vector<8x128xf32>
    %15 = arith.addf %12, %14 : vector<8x128xf32>
    %16 = arith.negf %15 : vector<8x128xf32>
    %17 = math.exp %16 : vector<8x128xf32>
    %cst_11 = arith.constant 1.000000e+00 : f32
    %18 = vector.broadcast %cst_11 : f32 to vector<8x128xf32>
    %19 = arith.addf %18, %17 : vector<8x128xf32>
    %20 = arith.divf %18, %19 : vector<8x128xf32>
    %c0_12 = arith.constant 0 : index
    %c0_13 = arith.constant 0 : index
    %21 = vector.load %arg6[%c0_12, %c0_13] : memref<1x8xf32, #tpu.memory_space<vmem>>, vector<1x8xf32>
    %cst_14 = arith.constant dense<0.000000e+00> : vector<1x128xf32>
    %22 = tpu.matmul %21, %20, %cst_14 {dimension_numbers = #tpu.dot_dimension_numbers<[1], [0], [0], [1], [0, 0, 1, 1], [], []>} : vector<1x8xf32>, vector<8x128xf32>, vector<1x128xf32> -> vector<1x128xf32>
    %c0_15 = arith.constant 0 : index
    %c0_16 = arith.constant 0 : index
    %23 = vector.load %arg7[%c0_15, %c0_16] : memref<1x1xf32, #tpu.memory_space<vmem>>, vector<1x1xf32>
    %24 = vector.broadcast %23 : vector<1x1xf32> to vector<1x128xf32>
    %25 = arith.addf %22, %24 : vector<1x128xf32>
    %c0_17 = arith.constant 0 : index
    %c0_18 = arith.constant 0 : index
    %26 = vector.load %arg8[%c0_17, %c0_18] : memref<1x128xf32, #tpu.memory_space<vmem>>, vector<1x128xf32>
    tpu.vector_store %arg8[%c0_17, %c0_18], %25 {strides = array<i32>} : memref<1x128xf32, #tpu.memory_space<vmem>>, vector<1x128xf32>,
    return
  }
  func.func @transform_0(%arg0: i32) -> (i32, i32) {
    %c0_i32 = arith.constant 0 : i32
    %c0_i32_0 = arith.constant 0 : i32
    return %c0_i32, %arg0 : i32, i32
  }
  func.func @transform_1(%arg0: i32) -> (i32, i32) {
    %c0_i32 = arith.constant 0 : i32
    %c0_i32_0 = arith.constant 0 : i32
    %c0_i32_1 = arith.constant 0 : i32
    return %c0_i32, %c0_i32_0 : i32, i32
  }
  func.func @transform_2(%arg0: i32) -> (i32, i32) {
    %c0_i32 = arith.constant 0 : i32
    %c0_i32_0 = arith.constant 0 : i32
    %c0_i32_1 = arith.constant 0 : i32
    return %c0_i32, %c0_i32_0 : i32, i32
  }
  func.func @transform_3(%arg0: i32) -> (i32, i32) {
    %c0_i32 = arith.constant 0 : i32
    %c0_i32_0 = arith.constant 0 : i32
    %c0_i32_1 = arith.constant 0 : i32
    return %c0_i32, %c0_i32_0 : i32, i32
  }
  func.func @transform_4(%arg0: i32) -> (i32, i32) {
    %c0_i32 = arith.constant 0 : i32
    %c0_i32_0 = arith.constant 0 : i32
    %c0_i32_1 = arith.constant 0 : i32
    return %c0_i32, %c0_i32_0 : i32, i32
  }
  func.func @transform_5(%arg0: i32) -> (i32, i32) {
    %c0_i32 = arith.constant 0 : i32
    %c0_i32_0 = arith.constant 0 : i32
    %c0_i32_1 = arith.constant 0 : i32
    return %c0_i32, %c0_i32_0 : i32, i32
  }
  func.func @transform_6(%arg0: i32) -> (i32, i32) {
    %c0_i32 = arith.constant 0 : i32
    %c0_i32_0 = arith.constant 0 : i32
    %c0_i32_1 = arith.constant 0 : i32
    return %c0_i32, %c0_i32_0 : i32, i32
  }
  func.func @transform_7(%arg0: i32) -> (i32, i32) {
    %c0_i32 = arith.constant 0 : i32
    %c0_i32_0 = arith.constant 0 : i32
    return %c0_i32, %arg0 : i32, i32
  }
}

</mosaic_0001>

<bundles_post_ra>
// kernel: tpu_custom_call.1
= control target key start
LH: loop header
LB: loop body
LE: loop exit
PB: predicated region body
PF: predicated region fallthrough
CT: control target
= control target key end

     0   :  { %s483_s0 = inlined_call_operand.vmem [shape: f32[16,8], index: 0, kind: input, shape index: {}]   ;;  %s484_s1 = inlined_call_operand.vmem [shape: f32[10,16], index: 1, kind: input, shape index: {}]   ;;  %s485_s2 = inlined_call_operand.vmem [shape: f32[10,1], index: 2, kind: input, shape index: {}]   ;;  %s486_s3 = inlined_call_operand.vmem [shape: f32[8,10], index: 3, kind: input, shape index: {}]   ;;  %s487_s4 = inlined_call_operand.vmem [shape: f32[8,1], index: 4, kind: input, shape index: {}]   ;;  %s488_s5 = inlined_call_operand.vmem [shape: f32[1,8], index: 5, kind: input, shape index: {}]   ;;  %s489_s6 = inlined_call_operand.<no memory space> [shape: f32[1,1], index: 6, kind: input, shape index: {}]   ;;  %s490_s7 = inlined_call_operand.hbm [shape: f32[1,8], index: 7, kind: output, shape index: {}]  }
   0x1   :  { %v12_v0 = vstv %s489_s6 }
   0x2   :  { %13 = vst [vmem:[#allocation2] sm:$0x1] %v12_v0 }
   0x3   :  { %v30_v1 = vld [vmem:[%s483_s0 + $0x8] sm:$0xff]  ;;  %v29_v2 = vld [vmem:[%s483_s0] sm:$0xff]  ;;  %vm45_vm0 = vcmask 130048   ;;  %v406_v6 = vmov 0  }
   0x4   :  { %v31_v3 = vld [vmem:[%s484_s1] sm:$0xff]  ;;  %347 = vmatprep.subr.mxu0 %v30_v1  ;;  %v34_v4 = vld [vmem:[%s485_s2 + $0x8] sm:$0x3]  ;;  %370 = vset.pattern.permute.xlu0 %v406_v6 }
   0x5   :  { %351 = vmatprep.mubr.msk.f32.mxu0 %vm45_vm0, %v31_v3  ;;  %348 = vmatpush3.msra.mxu0 %v30_v1  ;;  %v32_v5 = vld [vmem:[%s484_s1 + $0x8] sm:$0x3] }
   0x6   :  { %14 = vsyncpa [#allocation4], 0  ;;  %349 = vmatprep.subr.mxu0 %v29_v2  ;;  %42 = vperm.xlu0 %370, %v34_v4   ;;  %v33_v7 = vld [vmem:[%s485_s2] sm:$0xff]  ;;  %v407_v8 = vmov 0.0   ;;  %vm408_vm1 = vmmov 0   ;;  %vm150_vm2 = vcmask 1041408   ;;  %v237_v35 = vlaneseq }
   0x7   :  { %350 = vmatpush3.msra.mxu0 %v29_v2  ;;  %371 = vset.pattern.permute.xlu1 %v406_v6  ;;  %v140_v9 = vld [vmem:[%s487_s4] sm:$0xff]  ;;  %vm146_vm3 = vcmask 80896   ;;  %vm241_vm4 = vcmask 64512  }
   0x8   :  { %352 = vmatmul.mubr.msk.f32.vlgmr.msra.gmra.mxu0 %vm45_vm0, %v32_v5  ;;  %354 = vmatprep.subr.mxu1 %v407_v8  ;;  %v139_v24 = vld [vmem:[%s486_s3] sm:$0xff]  ;;  %v238_v36 = vshrl.u32 %v237_v35, 7  ;;  %s409_s3 = smov [#allocation3]  }
   0x9   :  { %361 = vmatprep.subr.mxu0 %v407_v8  ;;  %358 = vmatprep.mubr.msk.f32.mxu1 %vm408_vm1, %v407_v8  ;;  %v231_v10 = vld [vmem:[#allocation2] sm:$0x1]  ;;  %s322_s16 = sshll.u32 %s409_s3, 4  ;;  %s323_s16 = int_to_ptr.vmem [resolvable:$true] %s322_s16 }
   0xa   :  { %37 = vperm.xlu0 %370, %v33_v7   ;;  %363 = vmatprep.mubr.msk.f32.mxu0 %vm408_vm1, %v407_v8  ;;  %v230_v33 = vld [vmem:[%s488_s5] sm:$0x1]  ;;  %v239_v37 = vsub.s32 0, %v238_v36  ;;  %s384_s17 = scalar_lea.vmem %s323_s16, 16  ;;  %s388_s18 = scalar_lea.vmem %s323_s16, 32 }
   0xb   :  { %143 = vperm.xlu1 %371, %v140_v9   ;;  %p385_p0 = scmp.ne.s32.totalorder %s323_s16, %s384_s17  ;;  %p389_p1 = scmp.lt.s32.totalorder %s323_s16, %s323_s16 }
   0xc   :  { %p390_p2 = scmp.lt.s32.totalorder %s388_s18, %s384_s17 }
   0xe   :  { %p391_p3 = por %p390_p2, %p389_p1 }
   0xf   :  { %234 = vperm.xlu1 %371, %v231_v10  }
  0x10   :  { %p392_p4 = pnand %p391_p3, %p385_p0 }
  0x81   :  { %v43_v11 = vpop.permute.xlu0 %42 }
  0x85   :  { %v38_v14 = vpop.permute.xlu0 %37 }
  0x86   :  { %v144_v26 = vpop.permute.xlu1 %143 }
  0x8a   :  { %v235_v38 = vpop.permute.xlu1 %234 }
  0x8b   :  { %v240_v39 = vrot.slane %v235_v38, %v239_v37 }
  0xc8   :  { %v353_v12 = vpop.f32.mrf.mxu0 }
  0xc9   :  { %v124_v13 = vadd.f32 %v353_v12, %v43_v11 }
  0xca   :  { %v118_v15 = vpop.f32.mrf.mxu0 }
  0xcb   :  { %v333_v16 = vmul.f32 -1.442695, %v124_v13  ;;  %v119_v17 = vadd.f32 %v118_v15, %v38_v14 }
  0xcd   :  { %372 = vpow2.f32 %v333_v16  ;;  %v332_v18 = vmul.f32 -1.442695, %v119_v17 }
  0xcf   :  { %374 = vpow2.f32 %v332_v18 }
  0xda   :  { %v373_v19 = vpop.eup %372 }
  0xdb   :  { %v134_v20 = vadd.f32 1.0, %v373_v19 }
  0xdc   :  { %v375_v21 = vpop.eup %374 }
  0xdd   :  { %376 = vrcp.f32 %v134_v20  ;;  %v133_v22 = vadd.f32 1.0, %v375_v21 }
  0xdf   :  { %378 = vrcp.f32 %v133_v22 }
  0xea   :  { %v377_v23 = vpop.eup %376 }
  0xeb   :  { %355 = vmatpush3.msk.msra.mxu1 %vm150_vm2, %v377_v23 }
  0xec   :  { %v379_v25 = vpop.eup %378  ;;  %356 = vmatprep.subr.mxu1 %v407_v8 }
  0xed   :  { %357 = vmatpush3.msra.mxu1 %v379_v25 }
  0xee   :  { %359 = vmatmul.mubr.msk.f32.vlgmr.msra.gmra.mxu1 %vm146_vm3, %v139_v24 }
 0x1ae   :  { %v220_v27 = vpop.f32.mrf.mxu1 }
 0x1af   :  { %v221_v28 = vadd.f32 %v220_v27, %v144_v26 }
 0x1b0   :  { %v360_v29 = vpop.f32.mrf.mxu1 }
 0x1b1   :  { %v336_v30 = vmul.f32 -1.442695, %v221_v28 }
 0x1b3   :  { %380 = vpow2.f32 %v336_v30 }
 0x1c0   :  { %v381_v31 = vpop.eup %380 }
 0x1c1   :  { %v227_v32 = vadd.f32 1.0, %v381_v31 }
 0x1c3   :  { %382 = vrcp.f32 %v227_v32 }
 0x1d0   :  { %v383_v34 = vpop.eup %382 }
 0x1d1   :  { %362 = vmatpush3.msra.mxu0 %v383_v34 }
 0x1d2   :  { %364 = vmatmul.mubr.msk.f32.vlgmr.msra.gmra.mxu0 %vm241_vm4, %v230_v33 }
 0x292   :  { %v311_v40 = vpop.f32.mrf.mxu0 }
 0x293   :  { %v312_v41 = vadd.f32 %v311_v40, %v240_v39 }
 0x294   :  { %v365_v42 = vpop.f32.mrf.mxu0 }
 0x295   :  { %315 = vst [vmem:[#allocation3] sm:$0x1] %v312_v41 }
 0x296   :  { %395 = shalt.err (!%p392_p4)
}
 0x297   :  { %325 = dma.vmem_to_hbm [thread:$0]  %s323_s16, 16, %s490_s7, [#allocation4]  }
 0x298   :  { %404 = dma.done.wait [#allocation4], 16  }
 0x299   :  { %405 = vsyncadd [#allocation4], 4294967280 }
 0x29a   :  { %329 = vsyncpa [#allocation4], 1 }

</bundles_post_ra>
